<compile_context>
chip_gen: v7x
topology: tpu7x:2x2x1
jax: 0.10.0
libtpu: 0.0.40
codegen_flags: <defaults>
</compile_context>

<pallas_src>
import jax
import jax.numpy as jnp
from jax.experimental import pallas as pl
from jax.experimental.pallas import tpu as pltpu


def _outconv_kernel(w_ref, b_ref, x_ref, o_ref):
    # w_ref: SMEM (C_out*C_in,) f32   b_ref: SMEM (C_out,) f32
    # x_ref: VMEM (C_in, rows, lanes) o_ref: VMEM (C_out, rows, lanes)
    c_out = o_ref.shape[0]
    c_in = x_ref.shape[0]
    for co in range(c_out):
        acc = x_ref[0].astype(jnp.float32) * w_ref[co * c_in + 0]
        for ci in range(1, c_in):
            acc = acc + x_ref[ci].astype(jnp.float32) * w_ref[co * c_in + ci]
        o_ref[co] = (acc + b_ref[co]).astype(o_ref.dtype)


def _round_up(x, m):
    return ((x + m - 1) // m) * m


def outconv_pallas(x_nchw, weight, bias, *, max_rows=1024,
                   vmem_block_budget=6 * 1024 * 1024):
    """1x1 conv (OutConv.forward) via Pallas.

    x_nchw: (N, C_in, H, W)
    weight: (C_out, C_in, 1, 1)  -- PyTorch Conv2d weight layout
    bias:   (C_out,)
    returns (N, C_out, H, W)
    """
    N, C_in, H, W = x_nchw.shape
    C_out = weight.shape[0]
    HW = H * W
    itemsize = jnp.dtype(x_nchw.dtype).itemsize

    # Weights/bias as flat f32 scalars in SMEM (always f32 arithmetic; v5e has
    # no bf16 VPU, so any bf16 activations are upcast inside the kernel).
    w_flat = weight.astype(jnp.float32).reshape(C_out * C_in)
    b_vec = bias.astype(jnp.float32).reshape(C_out)

    if HW % 128 == 0:
        # Fast path: full-vreg spatial occupancy, blocks (C, rows, 128).
        R, L = HW // 128, 128
        bytes_per_row = (C_in + C_out) * 128 * itemsize  # in + out, per step row
        rows = min(max_rows, max(8, vmem_block_budget // bytes_per_row))
        rows = (rows // 8) * 8                 # block dim must be multiple of 8
        if rows > R:
            rows = R                           # full-dim block is always legal
        lane_tile = 128
    else:
        # Ragged HW: keep the whole spatial axis on lanes, tile it with a
        # partial edge block (no jnp.pad copy, no post-slice copy). OOB lanes
        # of the last tile only feed dropped output positions (elementwise op,
        # no cross-lane reduction).
        R, L = 1, HW
        rows = 1
        lane_tile = max(128,
                        (vmem_block_budget // ((C_in + C_out) * itemsize))
                        // 128 * 128)
        lane_tile = min(lane_tile, max_rows * 128, _round_up(HW, 128))

    # Pure reshape (no transpose, no data movement) of contiguous NCHW.
    x4 = x_nchw.reshape(N, C_in, R, L)
    grid = (N, pl.cdiv(R, rows), pl.cdiv(L, lane_tile))

    smem_spec = pl.BlockSpec(memory_space=pltpu.MemorySpace.SMEM)
    cost = pl.CostEstimate(
        flops=2 * N * HW * C_in * C_out,
        transcendentals=0,
        bytes_accessed=N * (C_in + C_out) * HW * itemsize,
    )

    out = pl.pallas_call(
        _outconv_kernel,
        out_shape=jax.ShapeDtypeStruct((N, C_out, R, L), x_nchw.dtype),
        grid_spec=pltpu.PrefetchScalarGridSpec(
            num_scalar_prefetch=0,
            grid=grid,
            in_specs=[
                smem_spec,   # weight (C_out*C_in,) resident in SMEM
                smem_spec,   # bias   (C_out,)      resident in SMEM
                pl.BlockSpec((None, C_in, rows, lane_tile),
                             lambda n, jr, jl: (n, 0, jr, jl)),
            ],
            out_specs=pl.BlockSpec((None, C_out, rows, lane_tile),
                                   lambda n, jr, jl: (n, 0, jr, jl)),
        ),
        compiler_params=pltpu.CompilerParams(
            # All grid axes independent -> shard across v7x's 2 TensorCores.
            dimension_semantics=("parallel", "parallel", "parallel"),
            vmem_limit_bytes=32 * 1024 * 1024,
        ),
        cost_estimate=cost,
    )(w_flat, b_vec, x4)

    return out.reshape(N, C_out, H, W)


if __name__ == "__main__":
    key = jax.random.PRNGKey(0)
    k_x, k_w, k_b = jax.random.split(key, 3)

    N, C_in, C_out, H, W = 2, 4, 3, 16, 16
    x = jax.random.normal(k_x, (N, C_in, H, W), dtype=jnp.float32)
    # Deterministic synthetic params with nn.Conv2d(in, out, kernel_size=1) shapes.
    weight = jax.random.normal(k_w, (C_out, C_in, 1, 1), dtype=jnp.float32) * 0.1
    bias = jax.random.normal(k_b, (C_out,), dtype=jnp.float32) * 0.1

    y = outconv_pallas(x, weight, bias)
    jax.block_until_ready(y)

    # Reference check (plain JAX einsum == 1x1 conv semantics).
    y_ref = jnp.einsum("nchw,oc->nohw", x, weight.reshape(C_out, C_in)) \
        + bias.reshape(1, C_out, 1, 1)
    assert y.shape == (N, C_out, H, W)
    assert jnp.allclose(y, y_ref, atol=1e-5, rtol=1e-5)

    print("KERNEL_OK")
</pallas_src>

<mosaic_0001>
module attributes {stable_mosaic.version = 11 : i64} {
  func.func @_outconv_kernel(%arg0: i32, %arg1: i32, %arg2: i32, %arg3: memref<12xf32, #tpu.memory_space<smem>>, %arg4: memref<3xf32, #tpu.memory_space<smem>>, %arg5: memref<1x4x2x128xf32, #tpu.memory_space<vmem>>, %arg6: memref<1x3x2x128xf32, #tpu.memory_space<vmem>>) attributes {dimension_semantics = [#tpu.dimension_semantics<parallel>, #tpu.dimension_semantics<parallel>, #tpu.dimension_semantics<parallel>], iteration_bounds = array<i64: 2, 1, 1>, scalar_prefetch = 0 : i64, scratch_operands = 0 : i64, tpu.core_type = #tpu.core_type<tc>, window_params = [{transform_indices = @transform_0, window_bounds = array<i64: 12>}, {transform_indices = @transform_1, window_bounds = array<i64: 3>}, {transform_indices = @transform_2, window_bounds = array<i64: 1, 4, 2, 128>}, {transform_indices = @transform_3, window_bounds = array<i64: 1, 3, 2, 128>}]} {
    %c0 = arith.constant 0 : index
    %c0_0 = arith.constant 0 : index
    %c0_1 = arith.constant 0 : index
    %c0_2 = arith.constant 0 : index
    %0 = vector.load %arg5[%c0, %c0_0, %c0_1, %c0_2] : memref<1x4x2x128xf32, #tpu.memory_space<vmem>>, vector<1x1x2x128xf32>
    %1 = vector.shape_cast %0 : vector<1x1x2x128xf32> to vector<2x128xf32>
    %c0_3 = arith.constant 0 : index
    %2 = memref.load %arg3[%c0_3] : memref<12xf32, #tpu.memory_space<smem>>
    %3 = vector.broadcast %2 : f32 to vector<2x128xf32>
    %4 = arith.mulf %1, %3 : vector<2x128xf32>
    %c0_4 = arith.constant 0 : index
    %c1 = arith.constant 1 : index
    %c0_5 = arith.constant 0 : index
    %c0_6 = arith.constant 0 : index
    %5 = vector.load %arg5[%c0_4, %c1, %c0_5, %c0_6] : memref<1x4x2x128xf32, #tpu.memory_space<vmem>>, vector<1x1x2x128xf32>
    %6 = vector.shape_cast %5 : vector<1x1x2x128xf32> to vector<2x128xf32>
    %c1_7 = arith.constant 1 : index
    %7 = memref.load %arg3[%c1_7] : memref<12xf32, #tpu.memory_space<smem>>
    %8 = vector.broadcast %7 : f32 to vector<2x128xf32>
    %9 = arith.mulf %6, %8 : vector<2x128xf32>
    %10 = arith.addf %4, %9 : vector<2x128xf32>
    %c0_8 = arith.constant 0 : index
    %c2 = arith.constant 2 : index
    %c0_9 = arith.constant 0 : index
    %c0_10 = arith.constant 0 : index
    %11 = vector.load %arg5[%c0_8, %c2, %c0_9, %c0_10] : memref<1x4x2x128xf32, #tpu.memory_space<vmem>>, vector<1x1x2x128xf32>
    %12 = vector.shape_cast %11 : vector<1x1x2x128xf32> to vector<2x128xf32>
    %c2_11 = arith.constant 2 : index
    %13 = memref.load %arg3[%c2_11] : memref<12xf32, #tpu.memory_space<smem>>
    %14 = vector.broadcast %13 : f32 to vector<2x128xf32>
    %15 = arith.mulf %12, %14 : vector<2x128xf32>
    %16 = arith.addf %10, %15 : vector<2x128xf32>
    %c0_12 = arith.constant 0 : index
    %c3 = arith.constant 3 : index
    %c0_13 = arith.constant 0 : index
    %c0_14 = arith.constant 0 : index
    %17 = vector.load %arg5[%c0_12, %c3, %c0_13, %c0_14] : memref<1x4x2x128xf32, #tpu.memory_space<vmem>>, vector<1x1x2x128xf32>
    %18 = vector.shape_cast %17 : vector<1x1x2x128xf32> to vector<2x128xf32>
    %c3_15 = arith.constant 3 : index
    %19 = memref.load %arg3[%c3_15] : memref<12xf32, #tpu.memory_space<smem>>
    %20 = vector.broadcast %19 : f32 to vector<2x128xf32>
    %21 = arith.mulf %18, %20 : vector<2x128xf32>
    %22 = arith.addf %16, %21 : vector<2x128xf32>
    %c0_16 = arith.constant 0 : index
    %23 = memref.load %arg4[%c0_16] : memref<3xf32, #tpu.memory_space<smem>>
    %24 = vector.broadcast %23 : f32 to vector<2x128xf32>
    %25 = arith.addf %22, %24 : vector<2x128xf32>
    %c0_17 = arith.constant 0 : index
    %c0_18 = arith.constant 0 : index
    %c0_19 = arith.constant 0 : index
    %c0_20 = arith.constant 0 : index
    %26 = vector.load %arg6[%c0_17, %c0_18, %c0_19, %c0_20] : memref<1x3x2x128xf32, #tpu.memory_space<vmem>>, vector<1x1x2x128xf32>
    %27 = vector.shape_cast %26 : vector<1x1x2x128xf32> to vector<2x128xf32>
    %28 = vector.shape_cast %25 : vector<2x128xf32> to vector<1x1x2x128xf32>
    tpu.vector_store %arg6[%c0_17, %c0_18, %c0_19, %c0_20], %28 {strides = array<i32>} : memref<1x3x2x128xf32, #tpu.memory_space<vmem>>, vector<1x1x2x128xf32>,
    %c0_21 = arith.constant 0 : index
    %c0_22 = arith.constant 0 : index
    %c0_23 = arith.constant 0 : index
    %c0_24 = arith.constant 0 : index
    %29 = vector.load %arg5[%c0_21, %c0_22, %c0_23, %c0_24] : memref<1x4x2x128xf32, #tpu.memory_space<vmem>>, vector<1x1x2x128xf32>
    %30 = vector.shape_cast %29 : vector<1x1x2x128xf32> to vector<2x128xf32>
    %c4 = arith.constant 4 : index
    %31 = memref.load %arg3[%c4] : memref<12xf32, #tpu.memory_space<smem>>
    %32 = vector.broadcast %31 : f32 to vector<2x128xf32>
    %33 = arith.mulf %30, %32 : vector<2x128xf32>
    %c0_25 = arith.constant 0 : index
    %c1_26 = arith.constant 1 : index
    %c0_27 = arith.constant 0 : index
    %c0_28 = arith.constant 0 : index
    %34 = vector.load %arg5[%c0_25, %c1_26, %c0_27, %c0_28] : memref<1x4x2x128xf32, #tpu.memory_space<vmem>>, vector<1x1x2x128xf32>
    %35 = vector.shape_cast %34 : vector<1x1x2x128xf32> to vector<2x128xf32>
    %c5 = arith.constant 5 : index
    %36 = memref.load %arg3[%c5] : memref<12xf32, #tpu.memory_space<smem>>
    %37 = vector.broadcast %36 : f32 to vector<2x128xf32>
    %38 = arith.mulf %35, %37 : vector<2x128xf32>
    %39 = arith.addf %33, %38 : vector<2x128xf32>
    %c0_29 = arith.constant 0 : index
    %c2_30 = arith.constant 2 : index
    %c0_31 = arith.constant 0 : index
    %c0_32 = arith.constant 0 : index
    %40 = vector.load %arg5[%c0_29, %c2_30, %c0_31, %c0_32] : memref<1x4x2x128xf32, #tpu.memory_space<vmem>>, vector<1x1x2x128xf32>
    %41 = vector.shape_cast %40 : vector<1x1x2x128xf32> to vector<2x128xf32>
    %c6 = arith.constant 6 : index
    %42 = memref.load %arg3[%c6] : memref<12xf32, #tpu.memory_space<smem>>
    %43 = vector.broadcast %42 : f32 to vector<2x128xf32>
    %44 = arith.mulf %41, %43 : vector<2x128xf32>
    %45 = arith.addf %39, %44 : vector<2x128xf32>
    %c0_33 = arith.constant 0 : index
    %c3_34 = arith.constant 3 : index
    %c0_35 = arith.constant 0 : index
    %c0_36 = arith.constant 0 : index
    %46 = vector.load %arg5[%c0_33, %c3_34, %c0_35, %c0_36] : memref<1x4x2x128xf32, #tpu.memory_space<vmem>>, vector<1x1x2x128xf32>
    %47 = vector.shape_cast %46 : vector<1x1x2x128xf32> to vector<2x128xf32>
    %c7 = arith.constant 7 : index
    %48 = memref.load %arg3[%c7] : memref<12xf32, #tpu.memory_space<smem>>
    %49 = vector.broadcast %48 : f32 to vector<2x128xf32>
    %50 = arith.mulf %47, %49 : vector<2x128xf32>
    %51 = arith.addf %45, %50 : vector<2x128xf32>
    %c1_37 = arith.constant 1 : index
    %52 = memref.load %arg4[%c1_37] : memref<3xf32, #tpu.memory_space<smem>>
    %53 = vector.broadcast %52 : f32 to vector<2x128xf32>
    %54 = arith.addf %51, %53 : vector<2x128xf32>
    %c0_38 = arith.constant 0 : index
    %c1_39 = arith.constant 1 : index
    %c0_40 = arith.constant 0 : index
    %c0_41 = arith.constant 0 : index
    %55 = vector.load %arg6[%c0_38, %c1_39, %c0_40, %c0_41] : memref<1x3x2x128xf32, #tpu.memory_space<vmem>>, vector<1x1x2x128xf32>
    %56 = vector.shape_cast %55 : vector<1x1x2x128xf32> to vector<2x128xf32>
    %57 = vector.shape_cast %54 : vector<2x128xf32> to vector<1x1x2x128xf32>
    tpu.vector_store %arg6[%c0_38, %c1_39, %c0_40, %c0_41], %57 {strides = array<i32>} : memref<1x3x2x128xf32, #tpu.memory_space<vmem>>, vector<1x1x2x128xf32>,
    %c0_42 = arith.constant 0 : index
    %c0_43 = arith.constant 0 : index
    %c0_44 = arith.constant 0 : index
    %c0_45 = arith.constant 0 : index
    %58 = vector.load %arg5[%c0_42, %c0_43, %c0_44, %c0_45] : memref<1x4x2x128xf32, #tpu.memory_space<vmem>>, vector<1x1x2x128xf32>
    %59 = vector.shape_cast %58 : vector<1x1x2x128xf32> to vector<2x128xf32>
    %c8 = arith.constant 8 : index
    %60 = memref.load %arg3[%c8] : memref<12xf32, #tpu.memory_space<smem>>
    %61 = vector.broadcast %60 : f32 to vector<2x128xf32>
    %62 = arith.mulf %59, %61 : vector<2x128xf32>
    %c0_46 = arith.constant 0 : index
    %c1_47 = arith.constant 1 : index
    %c0_48 = arith.constant 0 : index
    %c0_49 = arith.constant 0 : index
    %63 = vector.load %arg5[%c0_46, %c1_47, %c0_48, %c0_49] : memref<1x4x2x128xf32, #tpu.memory_space<vmem>>, vector<1x1x2x128xf32>
    %64 = vector.shape_cast %63 : vector<1x1x2x128xf32> to vector<2x128xf32>
    %c9 = arith.constant 9 : index
    %65 = memref.load %arg3[%c9] : memref<12xf32, #tpu.memory_space<smem>>
    %66 = vector.broadcast %65 : f32 to vector<2x128xf32>
    %67 = arith.mulf %64, %66 : vector<2x128xf32>
    %68 = arith.addf %62, %67 : vector<2x128xf32>
    %c0_50 = arith.constant 0 : index
    %c2_51 = arith.constant 2 : index
    %c0_52 = arith.constant 0 : index
    %c0_53 = arith.constant 0 : index
    %69 = vector.load %arg5[%c0_50, %c2_51, %c0_52, %c0_53] : memref<1x4x2x128xf32, #tpu.memory_space<vmem>>, vector<1x1x2x128xf32>
    %70 = vector.shape_cast %69 : vector<1x1x2x128xf32> to vector<2x128xf32>
    %c10 = arith.constant 10 : index
    %71 = memref.load %arg3[%c10] : memref<12xf32, #tpu.memory_space<smem>>
    %72 = vector.broadcast %71 : f32 to vector<2x128xf32>
    %73 = arith.mulf %70, %72 : vector<2x128xf32>
    %74 = arith.addf %68, %73 : vector<2x128xf32>
    %c0_54 = arith.constant 0 : index
    %c3_55 = arith.constant 3 : index
    %c0_56 = arith.constant 0 : index
    %c0_57 = arith.constant 0 : index
    %75 = vector.load %arg5[%c0_54, %c3_55, %c0_56, %c0_57] : memref<1x4x2x128xf32, #tpu.memory_space<vmem>>, vector<1x1x2x128xf32>
    %76 = vector.shape_cast %75 : vector<1x1x2x128xf32> to vector<2x128xf32>
    %c11 = arith.constant 11 : index
    %77 = memref.load %arg3[%c11] : memref<12xf32, #tpu.memory_space<smem>>
    %78 = vector.broadcast %77 : f32 to vector<2x128xf32>
    %79 = arith.mulf %76, %78 : vector<2x128xf32>
    %80 = arith.addf %74, %79 : vector<2x128xf32>
    %c2_58 = arith.constant 2 : index
    %81 = memref.load %arg4[%c2_58] : memref<3xf32, #tpu.memory_space<smem>>
    %82 = vector.broadcast %81 : f32 to vector<2x128xf32>
    %83 = arith.addf %80, %82 : vector<2x128xf32>
    %c0_59 = arith.constant 0 : index
    %c2_60 = arith.constant 2 : index
    %c0_61 = arith.constant 0 : index
    %c0_62 = arith.constant 0 : index
    %84 = vector.load %arg6[%c0_59, %c2_60, %c0_61, %c0_62] : memref<1x3x2x128xf32, #tpu.memory_space<vmem>>, vector<1x1x2x128xf32>
    %85 = vector.shape_cast %84 : vector<1x1x2x128xf32> to vector<2x128xf32>
    %86 = vector.shape_cast %83 : vector<2x128xf32> to vector<1x1x2x128xf32>
    tpu.vector_store %arg6[%c0_59, %c2_60, %c0_61, %c0_62], %86 {strides = array<i32>} : memref<1x3x2x128xf32, #tpu.memory_space<vmem>>, vector<1x1x2x128xf32>,
    return
  }
  func.func @transform_0(%arg0: i32, %arg1: i32, %arg2: i32) -> i32 {
    %c0_i32 = arith.constant 0 : i32
    %c0_i32_0 = arith.constant 0 : i32
    return %c0_i32 : i32
  }
  func.func @transform_1(%arg0: i32, %arg1: i32, %arg2: i32) -> i32 {
    %c0_i32 = arith.constant 0 : i32
    %c0_i32_0 = arith.constant 0 : i32
    return %c0_i32 : i32
  }
  func.func @transform_2(%arg0: i32, %arg1: i32, %arg2: i32) -> (i32, i32, i32, i32) {
    %c0_i32 = arith.constant 0 : i32
    %c0_i32_0 = arith.constant 0 : i32
    return %arg0, %c0_i32, %arg1, %arg2 : i32, i32, i32, i32
  }
  func.func @transform_3(%arg0: i32, %arg1: i32, %arg2: i32) -> (i32, i32, i32, i32) {
    %c0_i32 = arith.constant 0 : i32
    %c0_i32_0 = arith.constant 0 : i32
    return %arg0, %c0_i32, %arg1, %arg2 : i32, i32, i32, i32
  }
}

</mosaic_0001>

<bundles_post_ra>
// kernel: tpu_custom_call.1
= control target key start
LH: loop header
LB: loop body
LE: loop exit
PB: predicated region body
PF: predicated region fallthrough
CT: control target
= control target key end

     0   :  { %8 = vsyncpa [#allocation5], 0  ;;  %s1019_s0 = inlined_call_operand.hbm [shape: f32[12], index: 0, kind: input, shape index: {}]   ;;  %s1020_s1 = inlined_call_operand.vmem [shape: f32[3], index: 1, kind: input, shape index: {}]   ;;  %s1021_s2 = inlined_call_operand.hbm [shape: f32[2,4,2,128], index: 2, kind: input, shape index: {}]   ;;  %s1022_s3 = inlined_call_operand.hbm [shape: f32[2,3,2,128], index: 3, kind: output, shape index: {}]  }
   0x1   :  { %9 = vsyncpa [#allocation6], 0 }
   0x2   :  { %10 = vsyncpa [#allocation3], 0 }
   0x3   :  { %12 = vsyncpa [#allocation3 + $0x1], 0 }
   0x4   :  { %13 = vsyncpa [#allocation4], 0 }
   0x5   :  { %15 = vsyncpa [#allocation4 + $0x1], 0  ;;  %s755_s12 = smov 0   ;;  %s757_s13 = smov 0  }
   0x6   :  { %s759_s14 = smov 0   ;;  %s761_s15 = smov 0  }
   0x7   :  { %s763_s16 = smov 0   ;;  %s765_s17 = smov 0  }
   0x8 LB: > { %s447_s18 = sadd.s32 4294967295, %s725_s17   ;;  %s448_s19 = sadd.s32 4294967294, %s725_s17   ;;  %s725_s17 = sphi %s765_s17, %s21_s17   ;;  %s721_s16 = sphi %s763_s16, %s1043_s16   ;;  %s717_s15 = sphi %s761_s15, %s1042_s15   ;;  %s713_s14 = sphi %s759_s14, %s1041_s14   ;;  %s709_s13 = sphi %s757_s13, %s1040_s13   ;;  %s705_s12 = sphi %s755_s12, %s1039_s12  }
   0x9   : > { %s93_s20 = sadd.s32 1, %s713_s14  ;;  %p100_p0 = scmp.ne.s32.totalorder %s713_s14, %s709_s13 }
   0xa   : > { %p101_p1 = scmp.eq.s32.totalorder %s725_s17, 0  ;;  %p106_p2 = scmp.ne.s32.totalorder %s709_s13, %s705_s12 }
   0xb   : > { %p793_p3 = scmp.eq.s32.totalorder %s447_s18, 0  ;;  %p134_p4 = scmp.eq.s32.totalorder %s447_s18, 1 }
   0xc   : > { %p102_p5 = por %p101_p1, %p100_p0  ;;  %p140_p6 = scmp.eq.s32.totalorder %s448_s19, 1 }
   0xd   : > { %s1027_s21 = scalar_select %p793_p3, 1, 0 }
   0xe   : > { %p799_p7 = por %p793_p3, %p106_p2  ;;  %p803_p8 = por %p134_p4, %p100_p0 }
   0xf   : > { %p807_p9 = por %p140_p6, %p106_p2  ;;  %p449_p10 = scmp.ge.s32.totalorder %s725_s17, 1 }
  0x10   : > { %s1028_s22 = scalar_select %p799_p7, 1, 0 }
  0x11   : > { %s1029_s23 = scalar_select %p803_p8, 1, 0 }
  0x12   : > { %s1030_s24 = scalar_select %p807_p9, 1, 0 }
  0x13   : > { %p147_p11 = scmp.lt.s32.totalorder %s725_s17, 3  ;;  %p519_p1 = scmp.lt.s32.totalorder %s725_s17, 2 }
  0x14   : > { %s169_s28 = sshll.u32 %s1020_s1, 4  ;;  %s180_s4 = sand.u32 1, %s713_s14   ;;  %s170_s28 = int_to_ptr.vmem [resolvable:$true] %s169_s28 }
  0x15   : > { %p814_p13 = pnand %p449_p10, %p147_p11  ;;  %p824_p4 = pnand %p519_p1, %p102_p5 }
  0x16   : > { %s40_s5 = sadd.s32 1, %s721_s16  ;;  %s577_s8 = scalar_lea.hbm %s1019_s0, 16 }
  0x17   : > { %p502_p0 = pneg %p814_p13  ;;  %p578_p5 = scmp.ne.s32.totalorder %s1019_s0, %s577_s8 }
  0x18   : > { %p584_p1 = scmp.lt.u32.totalorder %s577_s8, %s1019_s0 }
  0x19   : > { %p830_p2 = pnand %p502_p0, %p793_p3 }
  0x1b   : > { %p579_p6 = pneg %p830_p2 }
  0x1d   : > { %p580_p10 = pnand %p579_p6, %p578_p5 }
  0x1f   : > { %p581_p11 = pneg %p580_p10 }
  0x21   : > { %p586_p0 = pnand %p584_p1, %p581_p11 }
  0x23   : > { %589 = shalt.err (!%p586_p0)
}
  0x24   : > { %s727_s19 = smov [#allocation2]   ;;  %s590_s6 = scalar_lea.vmem %s170_s28, 16 }
  0x25   : > { %505 = dma.hbm_to_smem (!%p830_p2), %s1019_s0, 16, %s727_s19, [#allocation5]  }
  0x26   : > { %p591_p12 = scmp.ne.s32.totalorder %s170_s28, %s590_s6  ;;  %p598_p7 = scmp.lt.s32.totalorder %s170_s28, %s170_s28 }
  0x27   : > { %p599_p5 = scmp.lt.s32.totalorder %s590_s6, %s590_s6 }
  0x28   : > { %p593_p9 = pnand %p591_p12, %p579_p6 }
  0x29   : > { %p600_p10 = por %p599_p5, %p598_p7 }
  0x2a   : > { %p594_p8 = pneg %p593_p9 }
  0x2c   : > { %p601_p3 = pnand %p600_p10, %p594_p8 }
  0x2e   : > { %604 = shalt.err (!%p601_p3)
}
  0x2f   : > { %s728_s7 = smov [#allocation7]   ;;  %p42_p11 = scmp.ge.s32.totalorder %s40_s5, 2 }
  0x30   : > { %508 = dma.vmem_to_smem (!%p830_p2), %s170_s28, 16, %s728_s7, [#allocation6]  }
  0x31   : > { %s453_s8 = sshll.u32 %s180_s4, 3  ;;  %s487_s9 = sshll.u32 %s721_s16, 7 }
  0x32   : > { %s1045_s5 = smov (%p42_p11, %s40_s5), 0  ;;  %s862_s30 = scalar_lea.hbm %s1021_s2, %s487_s9 }
  0x33   : > { %s86_s18 = ssub.s32 %s721_s16, %s1045_s5  ;;  %s184_s19 = scalar_lea.vmem [#allocation8], %s453_s8 }
  0x34   : > { %s193_s28 = sshll.u32 %s184_s19, 4  ;;  %p91_p3 = scmp.eq.s32.totalorder %s86_s18, 0  ;;  %s866_s28 = int_to_ptr.vmem [resolvable:$true] %s193_s28 }
  0x35   : > { %s875_s27 = scalar_lea.sflag [#allocation3], %s180_s4  ;;  %s605_s6 = scalar_lea.hbm %s862_s30, 128 }
  0x36   : > { %s871_s26 = scalar_select %p91_p3, %s713_s14, %s93_s20  }
  0x37   : > { %p606_p7 = scmp.ne.s32.totalorder %s862_s30, %s605_s6  ;;  %p607_p8 = pneg %p824_p4 }
  0x38   : > { %s610_s9 = scalar_lea.hbm %s1021_s2, 256  ;;  %p611_p2 = scmp.lt.u32.totalorder %s862_s30, %s1021_s2 }
  0x39   : > { %p608_p9 = pnand %p607_p8, %p606_p7  ;;  %p612_p6 = scmp.lt.u32.totalorder %s610_s9, %s605_s6 }
  0x3a   : > { %p614_p0 = scmp.lt.u32.totalorder %s605_s6, %s862_s30 }
  0x3b   : > { %p609_p12 = pneg %p608_p9  ;;  %p613_p1 = por %p612_p6, %p611_p2 }
  0x3d   : > { %p615_p5 = por %p614_p0, %p613_p1 }
  0x3f   : > { %p616_p10 = pnand %p615_p5, %p609_p12 }
  0x41   : > { %619 = shalt.err (!%p616_p10)
}
  0x42   : > { %s620_s20 = scalar_lea.vmem %s866_s28, 128  ;;  %s729_s4 = smov [#allocation8]  }
  0x43   : > { %p621_p11 = scmp.ne.s32.totalorder %s866_s28, %s620_s20  ;;  %s625_s18 = sshll.u32 %s729_s4, 4  ;;  %s626_s18 = int_to_ptr.vmem [resolvable:$false] %s625_s18 }
  0x44   : > { %s627_s19 = scalar_lea.vmem %s626_s18, 256  ;;  %p628_p9 = scmp.lt.s32.totalorder %s866_s28, %s626_s18 }
  0x45   : > { %p623_p3 = pnand %p621_p11, %p607_p8  ;;  %p629_p2 = scmp.lt.s32.totalorder %s627_s19, %s620_s20 }
  0x47   : > { %p624_p7 = pneg %p623_p3  ;;  %p630_p6 = por %p629_p2, %p628_p9 }
  0x49   : > { %p631_p1 = pnand %p630_p6, %p624_p7 }
  0x4b   : > { %634 = shalt.err (!%p631_p1)
}
  0x4c   : > { %s730_s6 = smov 32   ;;  %s731_s7 = smov 2  }
  0x4d   : > { %512 = dma.hbm_to_vmem [thread:$0]  (!%p824_p4), %s862_s30, 128, %s866_s28, %s875_s27, %s730_s6, %s730_s6, %s731_s7  }
  0x4e   : > { %205 = sbr.rel (%p814_p13) target bundleno = 131 (0x83), region = 32  ;;  %p1034_p8 = scmp.ne.s32.totalorder (!%p814_p13), %s1027_s21, 0 }
  0x55   : > { %688 = dma.done.wait (%p1034_p8), [#allocation5], 16  }
  0x56   : > { %690 = vsyncadd (%p1034_p8), [#allocation5], 4294967280 }
  0x57   : > { %692 = dma.done.wait (%p1034_p8), [#allocation6], 16  }
  0x58   : > { %694 = vsyncadd (%p1034_p8), [#allocation6], 4294967280  ;;  %s914_s8 = sand.u32 1, %s709_s13   ;;  %p1035_p13 = scmp.ne.s32.totalorder %s1028_s22, 0 }
  0x59   : > { %s459_s25 = sshll.u32 %s914_s8, 3  ;;  %s216_s29 = scalar_lea.sflag [#allocation3], %s914_s8 }
  0x5a   : > { %s918_s30 = scalar_lea.vmem [#allocation8], %s459_s25 }
  0x5b   : > { %696 = dma.done.wait (%p1035_p13), %s216_s29, 128  }
  0x5c   : > { %698 = vsyncadd (%p1035_p13), %s216_s29, 4294967168 }
  0x5d   : > { %224 = sfence }
  0x5e   : > { %s244_s28 = sld [smem:[#allocation2]]  ;;  %s461_s21 = sld [smem:[#allocation2 + $0x1]]  ;;  %v243_v0 = vld [vmem:[%s918_s30] sm:$0x3]  ;;  %v460_v1 = vld [vmem:[%s918_s30 + $0x2] sm:$0x3] }
  0x5f   : > { %s463_s27 = sld [smem:[#allocation2 + $0x2]]  ;;  %s465_s9 = sld [smem:[#allocation2 + $0x3]]  ;;  %v462_v3 = vld [vmem:[%s918_s30 + $0x4] sm:$0x3]  ;;  %v464_v6 = vld [vmem:[%s918_s30 + $0x6] sm:$0x3] }
  0x60   : > { %s466_s10 = sld [smem:[#allocation2 + $0x4]]  ;;  %s926_s11 = sld [smem:[#allocation7]]  ;;  %v269_v9 = vld [vmem:[%s918_s30] sm:$0x3]  ;;  %v467_v12 = vld [vmem:[%s918_s30 + $0x2] sm:$0x3] }
  0x61   : > { %s468_s20 = sld [smem:[#allocation2 + $0x5]]  ;;  %s929_s22 = sld [smem:[#allocation2 + $0x6]]  ;;  %v469_v16 = vld [vmem:[%s918_s30 + $0x4] sm:$0x3]  ;;  %v471_v17 = vld [vmem:[%s918_s30 + $0x6] sm:$0x3] }
  0x62   : > { %s931_s4 = sld [smem:[#allocation2 + $0x7]]  ;;  %s934_s18 = sld [smem:[#allocation2 + $0x8]]  ;;  %v293_v20 = vld [vmem:[%s918_s30] sm:$0x3]  ;;  %v476_v25 = vld [vmem:[%s918_s30 + $0x2] sm:$0x3] }
  0x63   : > { %s937_s19 = sld [smem:[#allocation2 + $0x9]]  ;;  %s939_s6 = sld [smem:[#allocation2 + $0xa]]  ;;  %v478_v30 = vld [vmem:[%s918_s30 + $0x4] sm:$0x3]  ;;  %v480_v35 = vld [vmem:[%s918_s30 + $0x6] sm:$0x3] }
  0x64   : > { %v245_v2 = vstv %s244_s28  ;;  %v250_v5 = vstv %s461_s21  ;;  %s942_s7 = sld [smem:[#allocation7 + $0x1]]  ;;  %s944_s25 = sld [smem:[#allocation2 + $0xb]] }
  0x65   : > { %v246_v4 = vmul.f32 %v245_v2, %v243_v0  ;;  %v251_v7 = vmul.f32 %v460_v1, %v250_v5  ;;  %v256_v8 = vstv %s463_s27  ;;  %v262_v11 = vstv %s465_s9  ;;  %s488_s29 = smul.u32 6, %s914_s8  ;;  %s953_s28 = sld [smem:[#allocation7 + $0x2]] }
  0x66   : > { %v257_v10 = vmul.f32 %v462_v3, %v256_v8  ;;  %v263_v14 = vmul.f32 %v464_v6, %v262_v11  ;;  %v271_v15 = vstv %s466_s10  ;;  %v266_v26 = vstv %s926_s11  ;;  %s489_s9 = smul.u32 96, %s717_s15  ;;  %p1036_p12 = scmp.ne.s32.totalorder %s1029_s23, 0 }
  0x67   : > { %v252_v13 = vadd.f32 %v251_v7, %v246_v4  ;;  %v272_v18 = vmul.f32 %v271_v15, %v269_v9  ;;  %v275_v19 = vstv %s468_s20  ;;  %v280_v23 = vstv %s929_s22  ;;  %s242_s21 = scalar_lea.vmem [#allocation9], %s488_s29  ;;  %s318_s20 = scalar_lea.sflag [#allocation4], %s914_s8 }
  0x68   : > { %v276_v22 = vmul.f32 %v467_v12, %v275_v19  ;;  %v285_v24 = vstv %s931_s4  ;;  %v281_v27 = vmul.f32 %v469_v16, %v280_v23  ;;  %v295_v29 = vstv %s934_s18  ;;  %s333_s27 = sshll.u32 %s242_s21, 4  ;;  %s970_s11 = scalar_lea.hbm %s1022_s3, %s489_s9  ;;  %s965_s27 = int_to_ptr.vmem [resolvable:$true] %s333_s27 }
  0x69   : > { %v258_v21 = vadd.f32 %v257_v10, %v252_v13  ;;  %v286_v28 = vmul.f32 %v471_v17, %v285_v24  ;;  %v296_v33 = vmul.f32 %v295_v29, %v293_v20  ;;  %v299_v34 = vstv %s937_s19  ;;  %s635_s22 = scalar_lea.vmem %s965_s27, 96  ;;  %s732_s15 = smov [#allocation9]  }
  0x6a   : > { %v277_v32 = vadd.f32 %v276_v22, %v272_v18  ;;  %v300_v36 = vmul.f32 %v476_v25, %v299_v34  ;;  %v304_v37 = vstv %s939_s6  ;;  %v309_v38 = vstv %s944_s25  ;;  %p636_p4 = scmp.ne.s32.totalorder %s965_s27, %s635_s22  ;;  %s639_s4 = sshll.u32 %s732_s15, 4  ;;  %s640_s4 = int_to_ptr.vmem [resolvable:$false] %s639_s4 }
  0x6b   : > { %v264_v31 = vadd.f32 %v263_v14, %v258_v21  ;;  %v305_v41 = vmul.f32 %v478_v30, %v304_v37  ;;  %v289_v42 = vstv %s942_s7  ;;  %v310_v44 = vmul.f32 %v480_v35, %v309_v38  ;;  %s641_s18 = scalar_lea.vmem %s640_s4, 192  ;;  %p642_p10 = scmp.lt.s32.totalorder %s965_s27, %s640_s4 }
  0x6c   : > { %v282_v40 = vadd.f32 %v281_v27, %v277_v32  ;;  %v301_v43 = vadd.f32 %v300_v36, %v296_v33  ;;  %v313_v48 = vstv %s953_s28  ;;  %p637_p0 = pnand %p636_p4, %p1036_p12  ;;  %p643_p11 = scmp.lt.s32.totalorder %s641_s18, %s635_s22 }
  0x6d   : > { %v267_v39 = vadd.f32 %v266_v26, %v264_v31 }
  0x6e   : > { %v287_v45 = vadd.f32 %v286_v28, %v282_v40  ;;  %v306_v46 = vadd.f32 %v305_v41, %v301_v43  ;;  %p638_p5 = pneg %p637_p0  ;;  %p644_p3 = por %p643_p11, %p642_p10 }
  0x6f   : > { %268 = vst [vmem:[%s242_s21] sm:$0x3] %v267_v39 }
  0x70   : > { %v290_v47 = vadd.f32 %v289_v42, %v287_v45  ;;  %v311_v49 = vadd.f32 %v310_v44, %v306_v46  ;;  %p645_p7 = pnand %p644_p3, %p638_p5 }
  0x72   : > { %474 = vst [vmem:[%s242_s21 + $0x2] sm:$0x3] %v290_v47  ;;  %v314_v50 = vadd.f32 %v313_v48, %v311_v49 }
  0x74   : > { %483 = vst [vmem:[%s242_s21 + $0x4] sm:$0x3] %v314_v50 }
  0x75   : > { %648 = shalt.err (!%p645_p7)
}
  0x76   : > { %s649_s19 = scalar_lea.hbm %s970_s11, 96  ;;  %s653_s25 = scalar_lea.hbm %s1022_s3, 192 }
  0x77   : > { %p650_p9 = scmp.ne.s32.totalorder %s970_s11, %s649_s19  ;;  %p654_p1 = scmp.lt.u32.totalorder %s970_s11, %s1022_s3 }
  0x78   : > { %p655_p8 = scmp.lt.u32.totalorder %s653_s25, %s649_s19  ;;  %p657_p4 = scmp.lt.u32.totalorder %s649_s19, %s970_s11 }
  0x79   : > { %p651_p2 = pnand %p650_p9, %p1036_p12 }
  0x7a   : > { %p656_p13 = por %p655_p8, %p654_p1 }
  0x7b   : > { %p652_p6 = pneg %p651_p2 }
  0x7c   : > { %p658_p0 = por %p657_p4, %p656_p13 }
  0x7e   : > { %p659_p5 = pnand %p658_p0, %p652_p6 }
  0x80   : > { %662 = shalt.err (!%p659_p5)
}
  0x81   : > { %s733_s21 = smov 32   ;;  %s734_s9 = smov 2  }
  0x82   : > { %500 = dma.vmem_to_hbm [thread:$0]  (%p1036_p12), %s965_s27, 96, %s970_s11, %s318_s20, %s733_s21, %s733_s21, %s734_s9  }
  0x83 PF: > { %s348_s30 = sand.u32 1, %s705_s12   ;;  %p1037_p10 = scmp.ne.s32.totalorder %s1030_s24, 0 }
  0x84   : > { %p1038_p11 = scmp.ge.s32.totalorder %s725_s17, 2  ;;  %s349_s10 = scalar_lea.sflag [#allocation4], %s348_s30 }
  0x86   : > { %p514_p3 = pnand %p1038_p11, %p1037_p10 }
  0x88   : > { %700 = dma.done.wait (!%p514_p3), %s349_s10, 96  }
  0x89   : > { %702 = vsyncadd (!%p514_p3), %s349_s10, 4294967200  ;;  %s21_s17 = sadd.s32 1, %s725_s17   ;;  %s1039_s12 = smov %s709_s13 }
  0x8a   : > { %p18_p7 = scmp.ge.s32.totalorder %s21_s17, 4   ;;  %s1040_s13 = smov %s713_s14 }
  0x8b   : > { %s1041_s14 = smov %s871_s26  ;;  %s1042_s15 = smov %s721_s16 }
  0x8c   : > { %s1043_s16 = smov %s1045_s5  ;;  %20 = sbr.rel (!%p18_p7) target bundleno = 8 (0x8), region = 92 }
  0x93   :  { %354 = vsyncpa [#allocation3], 1 }
  0x94   :  { %356 = vsyncpa [#allocation3 + $0x1], 1 }
  0x95   :  { %357 = vsyncpa [#allocation4], 1 }
  0x96   :  { %359 = vsyncpa [#allocation4 + $0x1], 1 }
  0x97   :  { %360 = vsyncpa [#allocation5], 1 }
  0x98   :  { %362 = vsyncpa [#allocation5 + $0x1], 1 }
  0x99   :  { %363 = vsyncpa [#allocation6], 1 }
  0x9a   :  { %365 = vsyncpa [#allocation6 + $0x1], 1 }

</bundles_post_ra>
